<compile_context>
chip_gen: v5e
topology: v5e:2x2
jax: 0.10.0
libtpu: 0.0.40
codegen_flags: <defaults>
</compile_context>

<pallas_src>
import jax
import jax.numpy as jnp
from jax import lax
from jax.experimental import pallas as pl
from jax.experimental.pallas import tpu as pltpu


_TN1_MAX = 2048            # stage-1 lane tile cap (mem-bound; >=512 near HBM roofline)
_TN2_MAX = 8192            # stage-2 lane tile cap (amortizes sequential grid-step overhead)
_VMEM_LIMIT = 32 * 1024 * 1024   # explicit scoped-VMEM limit (safe on v5e/v6e/v7x)


def _round_up(x, m):
    return ((x + m - 1) // m) * m


def _pick_tile(n, cap, align=128):
    """Tile (multiple of align, <= cap) minimizing round_up(n, tile); prefer larger."""
    best_t, best_pad = align, _round_up(n, align) - n
    t = align
    while t <= cap:
        pad = _round_up(n, t) - n
        if pad <= best_pad:          # ties -> larger tile
            best_t, best_pad = t, pad
        t += align
    return best_t


def _largest_divisor_tile(n, cap, align=128):
    """Largest multiple of align that divides n and is <= cap (n is a multiple of align)."""
    best = None
    t = align
    lim = min(n, cap)
    while t <= lim:
        if n % t == 0:
            best = t
        t += align
    return best if best is not None else n


# ----------------------------------------------------------------------------
# Kernel 1: softmax over classes + fg one-hot + NEGATED Lovasz errors.
#   Input blocks are (1, C, TN1) slices of (B, C, HW_pad); output blocks are
#   (C, TN1) columns of (C, N_pad) at column b*HW_pad + n*TN1 (fused transpose).
#   Padded columns (label == -1) get fg = 0 and -err = 0.
# ----------------------------------------------------------------------------
def _softmax_neg_errors_kernel(logits_ref, labels_ref, nerr_ref, fg_ref):
    x = logits_ref[0]                        # (C, TN) f32
    lab = labels_ref[0]                      # (1, TN) i32

    m = jnp.max(x, axis=0, keepdims=True)
    e = jnp.exp(x - m)
    probs = e / jnp.sum(e, axis=0, keepdims=True)

    C, TN = x.shape
    cls = lax.broadcasted_iota(jnp.int32, (C, TN), 0)
    is_fg = lab == cls                       # (C, TN) one-hot rows (false for padded)

    fg_ref[...] = is_fg.astype(jnp.float32).astype(fg_ref.dtype)   # bf16, exact 0/1
    # -(|fg - p|) == p - 1 where fg else -p ; padded columns forced to 0 so they
    # sort to the tail (err = 0) and contribute nothing to the loss.
    nerr = jnp.where(is_fg, probs - 1.0, -probs)
    nerr_ref[...] = jnp.where(lab >= 0, nerr, 0.0)


# ----------------------------------------------------------------------------
# Kernel 2: Lovasz extension on sorted (descending-err == ascending -err) data.
#   Chunked segment walk; MXU triangular-matmul cumsum; VMEM carries across tiles.
# ----------------------------------------------------------------------------
def _lovasz_kernel(nerr_ref, fg_ref, gts_ref, tri_ref, out_ref,
                   cumfg_c, jac_c, num_acc):
    s = pl.program_id(0)
    C, TN = nerr_ref.shape
    SEG = tri_ref.shape[0]
    n_seg = TN // SEG

    @pl.when(s == 0)
    def _():
        cumfg_c[...] = jnp.zeros_like(cumfg_c)
        jac_c[...] = jnp.zeros_like(jac_c)
        num_acc[...] = jnp.zeros_like(num_acc)

    gts = gts_ref[...]                                   # (C, 1) total fg per class
    tri = tri_ref[...]                                   # (SEG, SEG) bf16, tri[i,j]=1 iff i<=j
    lane = lax.broadcasted_iota(jnp.int32, (1, SEG), 1)  # lane index within a segment
    tile_base = s * TN                                   # global element offset of this tile

    cumfg = cumfg_c[...]                                 # (C, 1) running fg count
    jac_prev = jac_c[...]                                # (C, 1) last jaccard of prev segment
    dot_acc = jnp.zeros((C, SEG), jnp.float32)           # per-lane err*grad accumulator

    # Fully-unrolled fixed-width segment walk: static slices, bounded live vregs,
    # cumsum on the otherwise-idle MXU, single XLU roll per segment.
    for j in range(n_seg):
        lo = j * SEG
        fg = fg_ref[:, lo:lo + SEG]                      # (C, SEG) bf16 (0/1, sorted order)
        nerr = nerr_ref[:, lo:lo + SEG]                  # (C, SEG) f32 (negated errors)

        seg_csum = jnp.dot(fg, tri, preferred_element_type=jnp.float32)   # MXU, exact counts
        cum_fg = cumfg + seg_csum                        # global inclusive cumsum of fg

        pos = (tile_base + lo + 1 + lane).astype(jnp.float32)   # 1-based global position
        union = gts + (pos - cum_fg)                     # gts + cumsum(1 - fg) >= 1
        jaccard = 1.0 - (gts - cum_fg) / union           # (C, SEG)

        prev = pltpu.roll(jaccard, 1, axis=1)            # jaccard shifted right by one
        prev = jnp.where(lane == 0, jac_prev, prev)      # segment boundary from carry
        grad = jaccard - prev

        dot_acc = dot_acc + nerr * grad                  # err*grad = -(nerr*grad); negate later
        cumfg = cum_fg[:, SEG - 1:SEG]
        jac_prev = jaccard[:, SEG - 1:SEG]

    loss_c = -jnp.sum(dot_acc, axis=1, keepdims=True)    # (C, 1) per-class partial dot
    valid = (gts > 0.0).astype(jnp.float32)              # classes present in the batch
    num_acc[...] += jnp.sum(loss_c * valid, axis=(0, 1), keepdims=True)

    cumfg_c[...] = cumfg
    jac_c[...] = jac_prev

    @pl.when(s == pl.num_programs(0) - 1)
    def _():
        den = jnp.sum(valid, axis=(0, 1), keepdims=True)
        num = num_acc[...]
        out_ref[...] = jnp.where(den > 0.0, num / jnp.maximum(den, 1.0),
                                 jnp.zeros_like(num))


# ----------------------------------------------------------------------------
# Wrapper: padding, layout plumbing, and the descending sort.
# ----------------------------------------------------------------------------
def lovasz_softmax_loss(logits, labels):
    """logits: [B, C, H, W] f32, labels: [B, H, W] int. Returns scalar f32."""
    B, C, H, W = logits.shape
    HW = H * W

    # Stage-1 tile + padding (guarantees 128-aligned, VMEM-safe blocks on all chips).
    TN1 = _pick_tile(HW, _TN1_MAX)
    HW_pad = _round_up(HW, TN1)
    n_blocks1 = HW_pad // TN1
    N_pad = B * HW_pad

    logits_r = logits.reshape(B, C, HW).astype(jnp.float32)
    labels_r = labels.reshape(B, 1, HW).astype(jnp.int32)
    if HW_pad != HW:
        pad = HW_pad - HW
        logits_r = jnp.pad(logits_r, ((0, 0), (0, 0), (0, pad)))
        labels_r = jnp.pad(labels_r, ((0, 0), (0, 0), (0, pad)), constant_values=-1)

    nerr, fg = pl.pallas_call(
        _softmax_neg_errors_kernel,
        out_shape=(jax.ShapeDtypeStruct((C, N_pad), jnp.float32),
                   jax.ShapeDtypeStruct((C, N_pad), jnp.bfloat16)),
        grid_spec=pltpu.PrefetchScalarGridSpec(
            num_scalar_prefetch=0,
            grid=(B, n_blocks1),
            in_specs=[pl.BlockSpec((1, C, TN1), lambda b, n: (b, 0, n)),
                      pl.BlockSpec((1, 1, TN1), lambda b, n: (b, 0, n))],
            out_specs=(pl.BlockSpec((C, TN1), lambda b, n: (0, b * n_blocks1 + n)),
                       pl.BlockSpec((C, TN1), lambda b, n: (0, b * n_blocks1 + n))),
        ),
        compiler_params=pltpu.CompilerParams(
            dimension_semantics=("parallel", "parallel"),
            vmem_limit_bytes=_VMEM_LIMIT),
    )(logits_r, labels_r)

    # Per-class pixel counts from the original (unpadded) labels (exact int reduce).
    labels_flat = labels.reshape(1, B * HW).astype(jnp.int32)
    cls_ids = jnp.arange(C, dtype=jnp.int32)[:, None]
    gts = jnp.sum((labels_flat == cls_ids).astype(jnp.int32),
                  axis=1, keepdims=True).astype(jnp.float32)      # (C, 1)

    # Ascending sort of -err  ==  descending sort of err; fg rides as payload.
    nerr_sorted, fg_sorted = lax.sort((nerr, fg), dimension=1, num_keys=1)

    # Stage-2 tile / segment constants.
    TN2 = _largest_divisor_tile(N_pad, _TN2_MAX)
    n_tiles = N_pad // TN2
    SEG = 256 if TN2 % 256 == 0 else 128
    tri = (jnp.arange(SEG, dtype=jnp.int32)[:, None]
           <= jnp.arange(SEG, dtype=jnp.int32)[None, :]).astype(jnp.bfloat16)

    out = pl.pallas_call(
        _lovasz_kernel,
        out_shape=jax.ShapeDtypeStruct((1, 1), jnp.float32),
        grid_spec=pltpu.PrefetchScalarGridSpec(
            num_scalar_prefetch=0,
            grid=(n_tiles,),
            in_specs=[pl.BlockSpec((C, TN2), lambda s: (0, s)),
                      pl.BlockSpec((C, TN2), lambda s: (0, s)),
                      pl.BlockSpec((C, 1), lambda s: (0, 0)),
                      pl.BlockSpec((SEG, SEG), lambda s: (0, 0))],
            out_specs=pl.BlockSpec((1, 1), lambda s: (0, 0)),
            scratch_shapes=[pltpu.VMEM((C, 1), jnp.float32),   # cum-fg carry
                            pltpu.VMEM((C, 1), jnp.float32),   # last-jaccard carry
                            pltpu.VMEM((1, 1), jnp.float32)],  # numerator accumulator
        ),
        compiler_params=pltpu.CompilerParams(
            dimension_semantics=("arbitrary",),
            vmem_limit_bytes=_VMEM_LIMIT),
    )(nerr_sorted, fg_sorted, gts, tri)
    return out[0, 0]


# ----------------------------------------------------------------------------
# Pure-JAX reference (mirrors the PyTorch module) for a correctness check.
# ----------------------------------------------------------------------------
def lovasz_softmax_ref(logits, labels):
    probs = jax.nn.softmax(logits, axis=1)
    B, C, H, W = probs.shape
    probs_flat = jnp.transpose(probs, (0, 2, 3, 1)).reshape(-1, C)
    labels_flat = labels.reshape(-1)
    losses = []
    for c in range(C):
        fg = (labels_flat == c).astype(jnp.float32)
        if float(fg.sum()) == 0.0:
            continue
        errors = jnp.abs(fg - probs_flat[:, c])
        perm = jnp.argsort(-errors)
        errors_sorted = errors[perm]
        fg_sorted = fg[perm]
        gts = fg_sorted.sum()
        intersection = gts - jnp.cumsum(fg_sorted)
        union = gts + jnp.cumsum(1.0 - fg_sorted)
        jaccard = 1.0 - intersection / union
        grad = jnp.concatenate([jaccard[:1], jaccard[1:] - jaccard[:-1]])
        losses.append(jnp.dot(errors_sorted, grad))
    return jnp.mean(jnp.stack(losses)) if losses else jnp.array(0.0, jnp.float32)


if __name__ == "__main__":
    key = jax.random.PRNGKey(0)
    keys = jax.random.split(key, 6)

    loss_fn = jax.jit(lovasz_softmax_loss)

    # Small canonical shape (single stage-2 tile, 2 MXU-cumsum segments).
    B, C, H, W = 2, 4, 16, 16
    logits = jax.random.normal(keys[0], (B, C, H, W), dtype=jnp.float32)
    labels = jax.random.randint(keys[1], (B, H, W), 0, C, dtype=jnp.int32)
    loss = jax.block_until_ready(loss_fn(logits, labels))
    ref = lovasz_softmax_ref(logits, labels)
    assert abs(float(loss) - float(ref)) < 1e-4, (float(loss), float(ref))

    # Exercises multi-tile stage-2 carries (N = 16384 > TN2 = 8192), multi-block
    # fused-transpose stage 1, and an absent class (class 5 unused).
    B2, C2, H2, W2 = 2, 6, 64, 128
    logits2 = jax.random.normal(keys[2], (B2, C2, H2, W2), dtype=jnp.float32)
    labels2 = jax.random.randint(keys[3], (B2, H2, W2), 0, C2 - 1, dtype=jnp.int32)
    loss2 = jax.block_until_ready(loss_fn(logits2, labels2))
    ref2 = lovasz_softmax_ref(logits2, labels2)
    assert abs(float(loss2) - float(ref2)) < 1e-4, (float(loss2), float(ref2))

    # Non-128-aligned spatial size exercises the padding / masked-error path.
    B3, C3, H3, W3 = 2, 5, 10, 13
    logits3 = jax.random.normal(keys[4], (B3, C3, H3, W3), dtype=jnp.float32)
    labels3 = jax.random.randint(keys[5], (B3, H3, W3), 0, C3, dtype=jnp.int32)
    loss3 = jax.block_until_ready(loss_fn(logits3, labels3))
    ref3 = lovasz_softmax_ref(logits3, labels3)
    assert abs(float(loss3) - float(ref3)) < 1e-4, (float(loss3), float(ref3))

    print("KERNEL_OK")
</pallas_src>

<mosaic_0001>
module attributes {stable_mosaic.version = 11 : i64} {
  func.func @_softmax_neg_errors_kernel(%arg0: i32, %arg1: i32, %arg2: memref<1x4x256xf32, #tpu.memory_space<vmem>>, %arg3: memref<1x1x256xi32, #tpu.memory_space<vmem>>, %arg4: memref<4x256xf32, #tpu.memory_space<vmem>>, %arg5: memref<4x256xbf16, #tpu.memory_space<vmem>>) attributes {dimension_semantics = [#tpu.dimension_semantics<parallel>, #tpu.dimension_semantics<parallel>], iteration_bounds = array<i64: 2, 1>, scalar_prefetch = 0 : i64, scratch_operands = 0 : i64, tpu.core_type = #tpu.core_type<tc>, window_params = [{transform_indices = @transform_0, window_bounds = array<i64: 1, 4, 256>}, {transform_indices = @transform_1, window_bounds = array<i64: 1, 1, 256>}, {transform_indices = @transform_2, window_bounds = array<i64: 4, 256>}, {transform_indices = @transform_3, window_bounds = array<i64: 4, 256>}]} {
    %c0 = arith.constant 0 : index
    %c0_0 = arith.constant 0 : index
    %c0_1 = arith.constant 0 : index
    %0 = vector.load %arg2[%c0, %c0_0, %c0_1] : memref<1x4x256xf32, #tpu.memory_space<vmem>>, vector<1x4x256xf32>
    %1 = vector.shape_cast %0 : vector<1x4x256xf32> to vector<4x256xf32>
    %c0_2 = arith.constant 0 : index
    %c0_3 = arith.constant 0 : index
    %c0_4 = arith.constant 0 : index
    %2 = vector.load %arg3[%c0_2, %c0_3, %c0_4] : memref<1x1x256xi32, #tpu.memory_space<vmem>>, vector<1x1x256xi32>
    %3 = vector.shape_cast %2 : vector<1x1x256xi32> to vector<1x256xi32>
    %cst = arith.constant dense<0xFF800000> : vector<256xf32>
    %4 = vector.multi_reduction <maximumf>, %1, %cst [0] : vector<4x256xf32> to vector<256xf32>
    %5 = vector.shape_cast %4 : vector<256xf32> to vector<1x256xf32>
    %6 = vector.broadcast %5 : vector<1x256xf32> to vector<4x256xf32>
    %7 = arith.subf %1, %6 : vector<4x256xf32>
    %8 = math.exp %7 : vector<4x256xf32>
    %cst_5 = arith.constant dense<0.000000e+00> : vector<256xf32>
    %9 = vector.multi_reduction <add>, %8, %cst_5 [0] : vector<4x256xf32> to vector<256xf32>
    %10 = vector.shape_cast %9 : vector<256xf32> to vector<1x256xf32>
    %11 = vector.broadcast %10 : vector<1x256xf32> to vector<4x256xf32>
    %12 = arith.divf %8, %11 : vector<4x256xf32>
    %13 = tpu.iota {dimensions = array<i32: 0>} : vector<4x256xi32>
    %14 = vector.broadcast %3 : vector<1x256xi32> to vector<4x256xi32>
    %15 = arith.cmpi eq, %14, %13 : vector<4x256xi32>
    %16 = arith.extui %15 : vector<4x256xi1> to vector<4x256xi32>
    %17 = arith.sitofp %16 : vector<4x256xi32> to vector<4x256xf32>
    %18 = arith.truncf %17 : vector<4x256xf32> to vector<4x256xbf16>
    %c0_6 = arith.constant 0 : index
    %c0_7 = arith.constant 0 : index
    %19 = vector.load %arg5[%c0_6, %c0_7] : memref<4x256xbf16, #tpu.memory_space<vmem>>, vector<4x256xbf16>
    tpu.vector_store %arg5[%c0_6, %c0_7], %18 {strides = array<i32>} : memref<4x256xbf16, #tpu.memory_space<vmem>>, vector<4x256xbf16>,
    %cst_8 = arith.constant 1.000000e+00 : f32
    %20 = vector.broadcast %cst_8 : f32 to vector<4x256xf32>
    %21 = arith.subf %12, %20 : vector<4x256xf32>
    %cst_9 = arith.constant 0.000000e+00 : f32
    %22 = vector.broadcast %cst_9 : f32 to vector<4x256xf32>
    %23 = arith.subf %22, %12 : vector<4x256xf32>
    %24 = arith.select %15, %21, %23 : vector<4x256xi1>, vector<4x256xf32>
    %c0_i32 = arith.constant 0 : i32
    %25 = vector.broadcast %c0_i32 : i32 to vector<1x256xi32>
    %26 = arith.cmpi sge, %3, %25 : vector<1x256xi32>
    %cst_10 = arith.constant 0.000000e+00 : f32
    %27 = vector.shape_cast %26 : vector<1x256xi1> to vector<1x256xi1>
    %28 = vector.broadcast %27 : vector<1x256xi1> to vector<4x256xi1>
    %29 = vector.broadcast %cst_10 : f32 to vector<4x256xf32>
    %30 = arith.select %28, %24, %29 : vector<4x256xi1>, vector<4x256xf32>
    %c0_11 = arith.constant 0 : index
    %c0_12 = arith.constant 0 : index
    %31 = vector.load %arg4[%c0_11, %c0_12] : memref<4x256xf32, #tpu.memory_space<vmem>>, vector<4x256xf32>
    tpu.vector_store %arg4[%c0_11, %c0_12], %30 {strides = array<i32>} : memref<4x256xf32, #tpu.memory_space<vmem>>, vector<4x256xf32>,
    return
  }
  func.func @transform_0(%arg0: i32, %arg1: i32) -> (i32, i32, i32) {
    %c0_i32 = arith.constant 0 : i32
    %c0_i32_0 = arith.constant 0 : i32
    return %arg0, %c0_i32, %arg1 : i32, i32, i32
  }
  func.func @transform_1(%arg0: i32, %arg1: i32) -> (i32, i32, i32) {
    %c0_i32 = arith.constant 0 : i32
    %c0_i32_0 = arith.constant 0 : i32
    return %arg0, %c0_i32, %arg1 : i32, i32, i32
  }
  func.func @transform_2(%arg0: i32, %arg1: i32) -> (i32, i32) {
    %c1_i32 = arith.constant 1 : i32
    %0 = arith.muli %arg0, %c1_i32 : i32
    %1 = arith.addi %0, %arg1 : i32
    %c0_i32 = arith.constant 0 : i32
    %c0_i32_0 = arith.constant 0 : i32
    return %c0_i32, %1 : i32, i32
  }
  func.func @transform_3(%arg0: i32, %arg1: i32) -> (i32, i32) {
    %c1_i32 = arith.constant 1 : i32
    %0 = arith.muli %arg0, %c1_i32 : i32
    %1 = arith.addi %0, %arg1 : i32
    %c0_i32 = arith.constant 0 : i32
    %c0_i32_0 = arith.constant 0 : i32
    return %c0_i32, %1 : i32, i32
  }
}

module attributes {stable_mosaic.version = 11 : i64} {
  func.func @_lovasz_kernel(%arg0: i32, %arg1: memref<4x512xf32, #tpu.memory_space<vmem>>, %arg2: memref<4x512xbf16, #tpu.memory_space<vmem>>, %arg3: memref<4x1xf32, #tpu.memory_space<vmem>>, %arg4: memref<256x256xbf16, #tpu.memory_space<vmem>>, %arg5: memref<1x1xf32, #tpu.memory_space<vmem>>, %arg6: memref<4x1xf32, #tpu.memory_space<vmem>>, %arg7: memref<4x1xf32, #tpu.memory_space<vmem>>, %arg8: memref<1x1xf32, #tpu.memory_space<vmem>>) attributes {dimension_semantics = [#tpu.dimension_semantics<arbitrary>], iteration_bounds = array<i64: 1>, scalar_prefetch = 0 : i64, scratch_operands = 3 : i64, tpu.core_type = #tpu.core_type<tc>, window_params = [{transform_indices = @transform_0, window_bounds = array<i64: 4, 512>}, {transform_indices = @transform_1, window_bounds = array<i64: 4, 512>}, {pipeline_mode = #tpu.pipeline_mode<synchronous>, transform_indices = @transform_2, window_bounds = array<i64: 4, 1>}, {pipeline_mode = #tpu.pipeline_mode<synchronous>, transform_indices = @transform_3, window_bounds = array<i64: 256, 256>}, {pipeline_mode = #tpu.pipeline_mode<synchronous>, transform_indices = @transform_4, window_bounds = array<i64: 1, 1>}]} {
    %c0_i32 = arith.constant 0 : i32
    %0 = arith.cmpi eq, %arg0, %c0_i32 : i32
    %1 = arith.extui %0 : i1 to i32
    %c0_i32_0 = arith.constant 0 : i32
    %2 = arith.cmpi ne, %1, %c0_i32_0 : i32
    scf.if %2 {
      %cst_39 = arith.constant 0.000000e+00 : f32
      %96 = vector.broadcast %cst_39 : f32 to vector<4x1xf32>
      %c0_40 = arith.constant 0 : index
      %c0_41 = arith.constant 0 : index
      %97 = vector.load %arg6[%c0_40, %c0_41] : memref<4x1xf32, #tpu.memory_space<vmem>>, vector<4x1xf32>
      tpu.vector_store %arg6[%c0_40, %c0_41], %96 {strides = array<i32>} : memref<4x1xf32, #tpu.memory_space<vmem>>, vector<4x1xf32>,
      %cst_42 = arith.constant 0.000000e+00 : f32
      %98 = vector.broadcast %cst_42 : f32 to vector<4x1xf32>
      %c0_43 = arith.constant 0 : index
      %c0_44 = arith.constant 0 : index
      %99 = vector.load %arg7[%c0_43, %c0_44] : memref<4x1xf32, #tpu.memory_space<vmem>>, vector<4x1xf32>
      tpu.vector_store %arg7[%c0_43, %c0_44], %98 {strides = array<i32>} : memref<4x1xf32, #tpu.memory_space<vmem>>, vector<4x1xf32>,
      %cst_45 = arith.constant 0.000000e+00 : f32
      %100 = vector.broadcast %cst_45 : f32 to vector<1x1xf32>
      %c0_46 = arith.constant 0 : index
      %c0_47 = arith.constant 0 : index
      %101 = vector.load %arg8[%c0_46, %c0_47] : memref<1x1xf32, #tpu.memory_space<vmem>>, vector<1x1xf32>
      tpu.vector_store %arg8[%c0_46, %c0_47], %100 {strides = array<i32>} : memref<1x1xf32, #tpu.memory_space<vmem>>, vector<1x1xf32>,
    } else {
    }
    %c0 = arith.constant 0 : index
    %c0_1 = arith.constant 0 : index
    %3 = vector.load %arg3[%c0, %c0_1] : memref<4x1xf32, #tpu.memory_space<vmem>>, vector<4x1xf32>
    %c0_2 = arith.constant 0 : index
    %c0_3 = arith.constant 0 : index
    %4 = vector.load %arg4[%c0_2, %c0_3] : memref<256x256xbf16, #tpu.memory_space<vmem>>, vector<256x256xbf16>
    %5 = tpu.iota {dimensions = array<i32: 1>} : vector<1x256xi32>
    %c512_i32 = arith.constant 512 : i32
    %6 = arith.muli %arg0, %c512_i32 : i32
    %c0_4 = arith.constant 0 : index
    %c0_5 = arith.constant 0 : index
    %7 = vector.load %arg6[%c0_4, %c0_5] : memref<4x1xf32, #tpu.memory_space<vmem>>, vector<4x1xf32>
    %c0_6 = arith.constant 0 : index
    %c0_7 = arith.constant 0 : index
    %8 = vector.load %arg7[%c0_6, %c0_7] : memref<4x1xf32, #tpu.memory_space<vmem>>, vector<4x1xf32>
    %cst = arith.constant 0.000000e+00 : f32
    %9 = vector.broadcast %cst : f32 to vector<4x256xf32>
    %c0_8 = arith.constant 0 : index
    %c0_9 = arith.constant 0 : index
    %10 = vector.load %arg2[%c0_8, %c0_9] : memref<4x512xbf16, #tpu.memory_space<vmem>>, vector<4x256xbf16>
    %c0_10 = arith.constant 0 : index
    %c0_11 = arith.constant 0 : index
    %11 = vector.load %arg1[%c0_10, %c0_11] : memref<4x512xf32, #tpu.memory_space<vmem>>, vector<4x256xf32>
    %cst_12 = arith.constant dense<0.000000e+00> : vector<4x256xf32>
    %12 = tpu.matmul %10, %4, %cst_12 {dimension_numbers = #tpu.dot_dimension_numbers<[1], [0], [0], [1], [0, 0, 1, 1], [], []>} : vector<4x256xbf16>, vector<256x256xbf16>, vector<4x256xf32> -> vector<4x256xf32>
    %13 = vector.broadcast %7 : vector<4x1xf32> to vector<4x256xf32>
    %14 = arith.addf %13, %12 : vector<4x256xf32>
    %c0_i32_13 = arith.constant 0 : i32
    %15 = arith.addi %6, %c0_i32_13 : i32
    %c1_i32 = arith.constant 1 : i32
    %16 = arith.addi %15, %c1_i32 : i32
    %17 = vector.broadcast %16 : i32 to vector<1x256xi32>
    %18 = arith.addi %17, %5 : vector<1x256xi32>
    %19 = arith.sitofp %18 : vector<1x256xi32> to vector<1x256xf32>
    %20 = vector.broadcast %19 : vector<1x256xf32> to vector<4x256xf32>
    %21 = arith.subf %20, %14 : vector<4x256xf32>
    %22 = vector.broadcast %3 : vector<4x1xf32> to vector<4x256xf32>
    %23 = arith.addf %22, %21 : vector<4x256xf32>
    %24 = vector.broadcast %3 : vector<4x1xf32> to vector<4x256xf32>
    %25 = arith.subf %24, %14 : vector<4x256xf32>
    %26 = arith.divf %25, %23 : vector<4x256xf32>
    %cst_14 = arith.constant 1.000000e+00 : f32
    %27 = vector.broadcast %cst_14 : f32 to vector<4x256xf32>
    %28 = arith.subf %27, %26 : vector<4x256xf32>
    %c1_i32_15 = arith.constant 1 : i32
    %29 = tpu.dynamic_rotate %28 by %c1_i32_15 dim 1 : vector<4x256xf32>, i32 -> vector<4x256xf32>
    %c0_i32_16 = arith.constant 0 : i32
    %30 = vector.broadcast %c0_i32_16 : i32 to vector<1x256xi32>
    %31 = arith.cmpi eq, %5, %30 : vector<1x256xi32>
    %32 = vector.shape_cast %31 : vector<1x256xi1> to vector<1x256xi1>
    %33 = vector.broadcast %32 : vector<1x256xi1> to vector<4x256xi1>
    %34 = vector.shape_cast %8 : vector<4x1xf32> to vector<4x1xf32>
    %35 = vector.broadcast %34 : vector<4x1xf32> to vector<4x256xf32>
    %36 = arith.select %33, %35, %29 : vector<4x256xi1>, vector<4x256xf32>
    %37 = arith.subf %28, %36 : vector<4x256xf32>
    %38 = arith.mulf %11, %37 : vector<4x256xf32>
    %39 = arith.addf %9, %38 : vector<4x256xf32>
    %40 = vector.extract_strided_slice %14 {offsets = [0, 255], sizes = [4, 1], strides = [1, 1]} : vector<4x256xf32> to vector<4x1xf32>
    %41 = vector.extract_strided_slice %28 {offsets = [0, 255], sizes = [4, 1], strides = [1, 1]} : vector<4x256xf32> to vector<4x1xf32>
    %c0_17 = arith.constant 0 : index
    %c256 = arith.constant 256 : index
    %42 = vector.load %arg2[%c0_17, %c256] : memref<4x512xbf16, #tpu.memory_space<vmem>>, vector<4x256xbf16>
    %c0_18 = arith.constant 0 : index
    %c256_19 = arith.constant 256 : index
    %43 = vector.load %arg1[%c0_18, %c256_19] : memref<4x512xf32, #tpu.memory_space<vmem>>, vector<4x256xf32>
    %cst_20 = arith.constant dense<0.000000e+00> : vector<4x256xf32>
    %44 = tpu.matmul %42, %4, %cst_20 {dimension_numbers = #tpu.dot_dimension_numbers<[1], [0], [0], [1], [0, 0, 1, 1], [], []>} : vector<4x256xbf16>, vector<256x256xbf16>, vector<4x256xf32> -> vector<4x256xf32>
    %45 = vector.broadcast %40 : vector<4x1xf32> to vector<4x256xf32>
    %46 = arith.addf %45, %44 : vector<4x256xf32>
    %c256_i32 = arith.constant 256 : i32
    %47 = arith.addi %6, %c256_i32 : i32
    %c1_i32_21 = arith.constant 1 : i32
    %48 = arith.addi %47, %c1_i32_21 : i32
    %49 = vector.broadcast %48 : i32 to vector<1x256xi32>
    %50 = arith.addi %49, %5 : vector<1x256xi32>
    %51 = arith.sitofp %50 : vector<1x256xi32> to vector<1x256xf32>
    %52 = vector.broadcast %51 : vector<1x256xf32> to vector<4x256xf32>
    %53 = arith.subf %52, %46 : vector<4x256xf32>
    %54 = vector.broadcast %3 : vector<4x1xf32> to vector<4x256xf32>
    %55 = arith.addf %54, %53 : vector<4x256xf32>
    %56 = vector.broadcast %3 : vector<4x1xf32> to vector<4x256xf32>
    %57 = arith.subf %56, %46 : vector<4x256xf32>
    %58 = arith.divf %57, %55 : vector<4x256xf32>
    %cst_22 = arith.constant 1.000000e+00 : f32
    %59 = vector.broadcast %cst_22 : f32 to vector<4x256xf32>
    %60 = arith.subf %59, %58 : vector<4x256xf32>
    %c1_i32_23 = arith.constant 1 : i32
    %61 = tpu.dynamic_rotate %60 by %c1_i32_23 dim 1 : vector<4x256xf32>, i32 -> vector<4x256xf32>
    %c0_i32_24 = arith.constant 0 : i32
    %62 = vector.broadcast %c0_i32_24 : i32 to vector<1x256xi32>
    %63 = arith.cmpi eq, %5, %62 : vector<1x256xi32>
    %64 = vector.shape_cast %63 : vector<1x256xi1> to vector<1x256xi1>
    %65 = vector.broadcast %64 : vector<1x256xi1> to vector<4x256xi1>
    %66 = vector.shape_cast %41 : vector<4x1xf32> to vector<4x1xf32>
    %67 = vector.broadcast %66 : vector<4x1xf32> to vector<4x256xf32>
    %68 = arith.select %65, %67, %61 : vector<4x256xi1>, vector<4x256xf32>
    %69 = arith.subf %60, %68 : vector<4x256xf32>
    %70 = arith.mulf %43, %69 : vector<4x256xf32>
    %71 = arith.addf %39, %70 : vector<4x256xf32>
    %72 = vector.extract_strided_slice %46 {offsets = [0, 255], sizes = [4, 1], strides = [1, 1]} : vector<4x256xf32> to vector<4x1xf32>
    %73 = vector.extract_strided_slice %60 {offsets = [0, 255], sizes = [4, 1], strides = [1, 1]} : vector<4x256xf32> to vector<4x1xf32>
    %cst_25 = arith.constant dense<0.000000e+00> : vector<4xf32>
    %74 = vector.multi_reduction <add>, %71, %cst_25 [1] : vector<4x256xf32> to vector<4xf32>
    %75 = vector.shape_cast %74 : vector<4xf32> to vector<4x1xf32>
    %cst_26 = arith.constant 0.000000e+00 : f32
    %76 = vector.broadcast %cst_26 : f32 to vector<4x1xf32>
    %77 = arith.subf %76, %75 : vector<4x1xf32>
    %cst_27 = arith.constant 0.000000e+00 : f32
    %78 = vector.broadcast %cst_27 : f32 to vector<4x1xf32>
    %79 = arith.cmpf ogt, %3, %78 : vector<4x1xf32>
    %80 = arith.extui %79 : vector<4x1xi1> to vector<4x1xi32>
    %81 = arith.sitofp %80 : vector<4x1xi32> to vector<4x1xf32>
    %c0_28 = arith.constant 0 : index
    %c0_29 = arith.constant 0 : index
    %82 = vector.load %arg8[%c0_28, %c0_29] : memref<1x1xf32, #tpu.memory_space<vmem>>, vector<1x1xf32>
    %83 = arith.mulf %77, %81 : vector<4x1xf32>
    %84 = vector.shape_cast %83 : vector<4x1xf32> to vector<1x4x1xf32>
    %cst_30 = arith.constant dense<0.000000e+00> : vector<1xf32>
    %85 = vector.multi_reduction <add>, %84, %cst_30 [1, 2] : vector<1x4x1xf32> to vector<1xf32>
    %86 = vector.shape_cast %85 : vector<1xf32> to vector<1x1x1xf32>
    %87 = vector.extract %86[0, 0, 0] : f32 from vector<1x1x1xf32>
    %88 = vector.broadcast %87 : f32 to vector<1x1xf32>
    %89 = arith.addf %82, %88 : vector<1x1xf32>
    %c0_31 = arith.constant 0 : index
    %c0_32 = arith.constant 0 : index
    %90 = vector.load %arg8[%c0_31, %c0_32] : memref<1x1xf32, #tpu.memory_space<vmem>>, vector<1x1xf32>
    tpu.vector_store %arg8[%c0_31, %c0_32], %89 {strides = array<i32>} : memref<1x1xf32, #tpu.memory_space<vmem>>, vector<1x1xf32>,
    %c0_33 = arith.constant 0 : index
    %c0_34 = arith.constant 0 : index
    %91 = vector.load %arg6[%c0_33, %c0_34] : memref<4x1xf32, #tpu.memory_space<vmem>>, vector<4x1xf32>
    tpu.vector_store %arg6[%c0_33, %c0_34], %72 {strides = array<i32>} : memref<4x1xf32, #tpu.memory_space<vmem>>, vector<4x1xf32>,
    %c0_35 = arith.constant 0 : index
    %c0_36 = arith.constant 0 : index
    %92 = vector.load %arg7[%c0_35, %c0_36] : memref<4x1xf32, #tpu.memory_space<vmem>>, vector<4x1xf32>
    tpu.vector_store %arg7[%c0_35, %c0_36], %73 {strides = array<i32>} : memref<4x1xf32, #tpu.memory_space<vmem>>, vector<4x1xf32>,
    %c0_i32_37 = arith.constant 0 : i32
    %93 = arith.cmpi eq, %arg0, %c0_i32_37 : i32
    %94 = arith.extui %93 : i1 to i32
    %c0_i32_38 = arith.constant 0 : i32
    %95 = arith.cmpi ne, %94, %c0_i32_38 : i32
    scf.if %95 {
      %96 = vector.shape_cast %81 : vector<4x1xf32> to vector<1x4x1xf32>
      %cst_39 = arith.constant dense<0.000000e+00> : vector<1xf32>
      %97 = vector.multi_reduction <add>, %96, %cst_39 [1, 2] : vector<1x4x1xf32> to vector<1xf32>
      %98 = vector.shape_cast %97 : vector<1xf32> to vector<1x1x1xf32>
      %99 = vector.extract %98[0, 0, 0] : f32 from vector<1x1x1xf32>
      %100 = vector.broadcast %99 : f32 to vector<1x1xf32>
      %c0_40 = arith.constant 0 : index
      %c0_41 = arith.constant 0 : index
      %101 = vector.load %arg8[%c0_40, %c0_41] : memref<1x1xf32, #tpu.memory_space<vmem>>, vector<1x1xf32>
      %cst_42 = arith.constant 0.000000e+00 : f32
      %102 = vector.broadcast %cst_42 : f32 to vector<1x1xf32>
      %103 = arith.cmpf ogt, %100, %102 : vector<1x1xf32>
      %cst_43 = arith.constant 1.000000e+00 : f32
      %104 = vector.broadcast %cst_43 : f32 to vector<1x1xf32>
      %105 = arith.maximumf %100, %104 : vector<1x1xf32>
      %106 = arith.divf %101, %105 : vector<1x1xf32>
      %cst_44 = arith.constant 0.000000e+00 : f32
      %107 = vector.broadcast %cst_44 : f32 to vector<1x1xf32>
      %108 = arith.select %103, %106, %107 : vector<1x1xi1>, vector<1x1xf32>
      %c0_45 = arith.constant 0 : index
      %c0_46 = arith.constant 0 : index
      %109 = vector.load %arg5[%c0_45, %c0_46] : memref<1x1xf32, #tpu.memory_space<vmem>>, vector<1x1xf32>
      tpu.vector_store %arg5[%c0_45, %c0_46], %108 {strides = array<i32>} : memref<1x1xf32, #tpu.memory_space<vmem>>, vector<1x1xf32>,
    } else {
    }
    return
  }
  func.func @transform_0(%arg0: i32) -> (i32, i32) {
    %c0_i32 = arith.constant 0 : i32
    %c0_i32_0 = arith.constant 0 : i32
    return %c0_i32, %arg0 : i32, i32
  }
  func.func @transform_1(%arg0: i32) -> (i32, i32) {
    %c0_i32 = arith.constant 0 : i32
    %c0_i32_0 = arith.constant 0 : i32
    return %c0_i32, %arg0 : i32, i32
  }
  func.func @transform_2(%arg0: i32) -> (i32, i32) {
    %c0_i32 = arith.constant 0 : i32
    %c0_i32_0 = arith.constant 0 : i32
    %c0_i32_1 = arith.constant 0 : i32
    return %c0_i32, %c0_i32_0 : i32, i32
  }
  func.func @transform_3(%arg0: i32) -> (i32, i32) {
    %c0_i32 = arith.constant 0 : i32
    %c0_i32_0 = arith.constant 0 : i32
    %c0_i32_1 = arith.constant 0 : i32
    return %c0_i32, %c0_i32_0 : i32, i32
  }
  func.func @transform_4(%arg0: i32) -> (i32, i32) {
    %c0_i32 = arith.constant 0 : i32
    %c0_i32_0 = arith.constant 0 : i32
    %c0_i32_1 = arith.constant 0 : i32
    return %c0_i32, %c0_i32_0 : i32, i32
  }
}

</mosaic_0001>

<bundles_post_ra>
// kernel: eq.12
= control target key start
LH: loop header
LB: loop body
LE: loop exit
PB: predicated region body
PF: predicated region fallthrough
CT: control target
= control target key end

     0   :  { %2 = vsyncpa [#allocation1], 0  ;;  %s100_s8 = smov [#allocation0]   ;;  %s124_s0 = inlined_call_operand.hbm [shape: s32[2,16,16], index: 0, kind: input, shape index: {}]   ;;  %s125_s1 = inlined_call_operand.vmem [shape: s32[512], index: 1, kind: output, shape index: {}]  }
   0x1   :  { %s6_s0 = sshll.u32 %s124_s0, 4  ;;  %s8_s9 = sshll.u32 %s100_s8, 4  ;;  %s7_s0 = int_to_ptr.hbm [resolvable:$true] %s6_s0  ;;  %s9_s9 = int_to_ptr.vmem [resolvable:$true] %s8_s9 }
   0x2   :  { %11 = dma.hbm_to_vmem [thread:$0]  %s7_s0, 512, %s9_s9, [#allocation1]  }
   0x3   :  { %98 = dma.done.wait [#allocation1], 512  }
   0x4   :  { %99 = vsyncadd [#allocation1], 4294966784  ;;  %v18_v0 = vld [vmem:[#allocation0 + $0x7] ss:$8 sm:$0xf]   ;;  %s101_s10 = smov 112  }
   0x5   :  { %v30_v1 = vld [vmem:[#allocation0 + $0x5] ss:$8 sm:$0xf]   ;;  %19 = vrot.lane.b32.xlu0 %v18_v0, %s101_s10  ;;  %s102_s11 = smov 80   ;;  %s103_s12 = smov 48   ;;  %vm15_vm0 = vcmask 130048  }
   0x6   :  { %31 = vrot.lane.b32.xlu1 %v30_v1, %s102_s11  ;;  %v42_v2 = vld [vmem:[#allocation0 + $0x3] ss:$8 sm:$0xf]   ;;  %v24_v3 = vld [vmem:[#allocation0 + $0x6] ss:$8 sm:$0xf]  }
   0x7   :  { %43 = vrot.lane.b32.xlu2 %v42_v2, %s103_s12  ;;  %v36_v4 = vld [vmem:[#allocation0 + $0x4] ss:$8 sm:$0xf]   ;;  %v48_v5 = vld [vmem:[#allocation0 + $0x2] ss:$8 sm:$0xf]  }
   0x8   :  { %s104_s13 = smov 96   ;;  %s105_s14 = smov 64   ;;  %v54_v6 = vld [vmem:[#allocation0 + $0x1] ss:$8 sm:$0xf]   ;;  %vm21_vm1 = vcmask 1048448  }
   0x9   :  { %s106_s15 = smov 32   ;;  %s107_s16 = smov 16   ;;  %v14_v7 = vld [vmem:[#allocation0] ss:$8 sm:$0xf]   ;;  %vm27_vm2 = vcmask 917248  }
   0xa   :  { %16 = vst.msk [vmem:[#allocation2] sm:$0xf] %vm15_vm0, %v14_v7   ;;  %vm33_vm3 = vcmask 786048   ;;  %vm39_vm4 = vcmask 654848   ;;  %vm45_vm5 = vcmask 523648   ;;  %vm51_vm6 = vcmask 392448  }
   0xb   :  { %vm57_vm7 = vcmask 261248  }
   0xd   :  { %25 = vrot.lane.b32.xlu0 %v24_v3, %s104_s13 }
   0xe   :  { %37 = vrot.lane.b32.xlu1 %v36_v4, %s105_s14 }
   0xf   :  { %49 = vrot.lane.b32.xlu2 %v48_v5, %s106_s15 }
  0x15   :  { %55 = vrot.lane.b32.xlu0 %v54_v6, %s107_s16 }
  0x61   :  { %v44_v8 = vpop.permute.xlu2 %43  }
  0x69   :  { %v50_v9 = vpop.permute.xlu2 %49  }
  0x77   :  { %v20_v10 = vpop.permute.xlu0 %19  }
  0x78   :  { %v32_v11 = vpop.permute.xlu1 %31   ;;  %22 = vst.msk [vmem:[#allocation2] sm:$0xf] %vm21_vm1, %v20_v10  }
  0x7f   :  { %v26_v12 = vpop.permute.xlu0 %25  }
  0x80   :  { %v38_v13 = vpop.permute.xlu1 %37   ;;  %28 = vst.msk [vmem:[#allocation2] sm:$0xf] %vm27_vm2, %v26_v12  }
  0x81   :  { %34 = vst.msk [vmem:[#allocation2] sm:$0xf] %vm33_vm3, %v32_v11  }
  0x82   :  { %40 = vst.msk [vmem:[#allocation2] sm:$0xf] %vm39_vm4, %v38_v13  }
  0x83   :  { %46 = vst.msk [vmem:[#allocation2] sm:$0xf] %vm45_vm5, %v44_v8  }
  0x84   :  { %52 = vst.msk [vmem:[#allocation2] sm:$0xf] %vm51_vm6, %v50_v9  }
  0x87   :  { %v56_v14 = vpop.permute.xlu0 %55  }
  0x88   :  { %58 = vst.msk [vmem:[#allocation2] sm:$0xf] %vm57_vm7, %v56_v14  }
  0x8f   :  { %v61_v15 = vld [vmem:[#allocation2] sm:$0xf] }
  0x90   :  { %64 = vst [vmem:[%s125_s1] sm:$0xf] %v61_v15 }
  0x91   :  { %65 = vsyncpa [#allocation1], 1 }

// kernel: lovasz_softmax_loss.2
= control target key start
LH: loop header
LB: loop body
LE: loop exit
PB: predicated region body
PF: predicated region fallthrough
CT: control target
= control target key end

     0   :  { %s597_s12 = smov 0   ;;  %s599_s13 = smov 0   ;;  %s672_s0 = inlined_call_operand.vmem [shape: f32[2,4,256], index: 0, kind: input, shape index: {}]   ;;  %s673_s1 = inlined_call_operand.vmem [shape: s32[2,1,256], index: 1, kind: input, shape index: {}]   ;;  %s674_s2 = inlined_call_operand.vmem [shape: f32[4,512], index: 2, kind: output, shape index: {0}]   ;;  %s675_s3 = inlined_call_operand.vmem [shape: bf16[4,512], index: 3, kind: output, shape index: {1}]  }
   0x1   :  { %s601_s14 = smov 0  }
   0x2 LB: > { %s26_s15 = sadd.s32 1, %s569_s13  ;;  %p507_p0 = scmp.ge.s32.totalorder %s573_s14, 1  ;;  %s573_s14 = sphi %s601_s14, %s14_s14   ;;  %s569_s13 = sphi %s599_s13, %s681_s13   ;;  %s565_s12 = sphi %s597_s12, %s680_s12  }
   0x3   : > { %p28_p1 = scmp.ge.s32.totalorder %s26_s15, 2  ;;  %p179_p2 = scmp.lt.s32.totalorder %s573_s14, 3 }
   0x5   : > { %s683_s15 = smov (%p28_p1, %s26_s15), 0  ;;  %p180_p3 = pnand %p507_p0, %p179_p2 }
   0x6   : > { %p223_p4 = scmp.lt.s32.totalorder (!%p180_p3), %s565_s12, 1  ;;  %s511_s25 = sshll.u32 (!%p180_p3), %s565_s12, 1 }
   0x7   : > { %183 = sbr.rel (%p180_p3) target bundleno = 119 (0x77), region = 28  ;;  %p243_p5 = scmp.lt.s32.totalorder (!%p180_p3), %s511_s25, 3 }
   0xc   : > { %s619_s16 = scalar_select %p223_p4, %s565_s12, 1  ;;  %vm265_vm0 = vcmask 1043456   ;;  %v328_v42 = vlaneseq  ;;  %v575_v47 = vmov 0.0   ;;  %vm341_vm3 = vcmask 1041408  }
   0xd   : > { %s685_s25 = smov (!%p243_p5, %s511_s25), 3 }
   0xe   : > { %s520_s17 = sshll.u32 %s619_s16, 3  ;;  %s510_s21 = sshll.u32 %s619_s16, 1  ;;  %v329_v44 = vshrl.u32 %v328_v42, 7 }
   0xf   : > { %s230_s20 = scalar_lea.vmem %s672_s0, %s520_s17  ;;  %s239_s24 = scalar_lea.vmem %s673_s1, %s510_s21 }
  0x10   : > { %v257_v0 = vld [vmem:[%s230_s20] sm:$0xff]  ;;  %s514_s26 = sshll.u32 %s685_s25, 1  ;;  %s512_s30 = sshll.u32 %s685_s25, 2 }
  0x11   : > { %260 = vst [vmem:[#allocation1] ss:$2 sm:$0xff] %v257_v0  ;;  %v258_v34 = vld [vmem:[%s239_s24] sm:$0x3]  ;;  %s254_s29 = scalar_lea.vmem %s675_s3, %s514_s26  ;;  %s246_s6 = scalar_lea.vmem %s674_s2, %s512_s30 }
  0x12   : > { %v330_v38 = vperm.slane %v258_v34, 0  ;;  %v331_v39 = vperm.slane %v258_v34, 1  ;;  %vm363_vm8 = vcmp.ge.s32.totalorder %v258_v34, 0 }
  0x14   : > { %vm638_vm1 = vcmp.eq.s32.totalorder %v330_v38, %v329_v44  ;;  %vm642_vm2 = vcmp.eq.s32.totalorder %v331_v39, %v329_v44 }
  0x15   : > { %v515_v48 = vsel %vm638_vm1, 1.0, %v575_v47  ;;  %v516_v49 = vsel %vm642_vm2, 1.0, %v575_v47 }
  0x16   : > { %v338_v50 = vpack.c.bf16 %v516_v49, %v515_v48 }
  0x18   : > { %v261_v1 = vld.sshfl [vmem:[#allocation1] sm:$0xff pattern:$0x75316420]  ;;  %v262_v2 = vld.sshfl [vmem:[#allocation1 + $0x8] sm:$0xff pattern:$0x75316420] }
  0x19   : > { %v266_v3 = vsel %vm265_vm0, %v261_v1, -inf  ;;  %v273_v4 = vsel %vm265_vm0, %v262_v2, -inf  ;;  %v340_v51 = vrot.slane %v338_v50, 2  ;;  %v576_v2 = vmov 0  }
  0x1a   : > { %v267_v5 = vrot.slane %v266_v3, 4  ;;  %v274_v6 = vrot.slane %v273_v4, 4 }
  0x1b   : > { %v344_v54 = vsel %vm341_vm3, %v338_v50, %v340_v51 }
  0x1c   : > { %v268_v7 = vmax.f32 %v266_v3, %v267_v5  ;;  %v275_v8 = vmax.f32 %v273_v4, %v274_v6  ;;  %346 = vst [vmem:[%s254_s29] sm:$0xf] %v344_v54  ;;  %v364_v3 = vsel %vm363_vm8, 1, %v576_v2 }
  0x1d   : > { %v366_v6 = vperm.slane %v364_v3, 1 }
  0x1e   : > { %v269_v9 = vrot.slane %v268_v7, 2  ;;  %v276_v10 = vrot.slane %v275_v8, 2 }
  0x1f   : > { %vm368_vm9 = vcmp.eq.s32.totalorder %v366_v6, 1 }
  0x20   : > { %v270_v11 = vmax.f32 %v268_v7, %v269_v9  ;;  %v277_v12 = vmax.f32 %v275_v8, %v276_v10  ;;  %v365_v7 = vperm.slane %v364_v3, 0 }
  0x22   : > { %v271_v13 = vrot.slane %v270_v11, 1  ;;  %v278_v14 = vrot.slane %v277_v12, 1  ;;  %vm367_vm10 = vcmp.eq.s32.totalorder %v365_v7, 1 }
  0x24   : > { %v279_v15 = vmax.f32 %v277_v12, %v278_v14  ;;  %v272_v16 = vmax.f32 %v270_v11, %v271_v13 }
  0x26   : > { %v282_v17 = vrot.slane %v279_v15, 4 }
  0x28   : > { %v283_v18 = vsel %vm265_vm0, %v272_v16, %v282_v17 }
  0x29   : > { %v285_v19 = vsub.f32 %v257_v0, %v283_v18 }
  0x2b   : > { %v286_v20 = vmul.f32 1.442695, %v285_v19 }
  0x2d   : > { %547 = vpow2.f32 %v286_v20 }
  0x33   : > { %v548_v21 = vpop.eup %547 }
  0x34   : > { %289 = vst [vmem:[#allocation1] ss:$2 sm:$0xff] %v548_v21 }
  0x3b   : > { %v290_v22 = vld.sshfl [vmem:[#allocation1] sm:$0xff pattern:$0x75316420]  ;;  %v291_v23 = vld.sshfl [vmem:[#allocation1 + $0x8] sm:$0xff pattern:$0x75316420] }
  0x3c   : > { %v294_v24 = vsel %vm265_vm0, %v290_v22, 0.0  ;;  %v301_v25 = vsel %vm265_vm0, %v291_v23, 0.0 }
  0x3d   : > { %v295_v26 = vrot.slane %v294_v24, 4  ;;  %v302_v27 = vrot.slane %v301_v25, 4 }
  0x3f   : > { %v296_v28 = vadd.f32 %v295_v26, %v294_v24  ;;  %v303_v29 = vadd.f32 %v302_v27, %v301_v25 }
  0x41   : > { %v297_v30 = vrot.slane %v296_v28, 2  ;;  %v304_v31 = vrot.slane %v303_v29, 2 }
  0x43   : > { %v298_v32 = vadd.f32 %v297_v30, %v296_v28  ;;  %v305_v33 = vadd.f32 %v304_v31, %v303_v29 }
  0x45   : > { %v299_v35 = vrot.slane %v298_v32, 1  ;;  %v306_v36 = vrot.slane %v305_v33, 1 }
  0x47   : > { %v307_v37 = vadd.f32 %v306_v36, %v305_v33  ;;  %v300_v40 = vadd.f32 %v299_v35, %v298_v32 }
  0x49   : > { %v310_v41 = vrot.slane %v307_v37, 4 }
  0x4b   : > { %v311_v43 = vsel %vm265_vm0, %v300_v40, %v310_v41 }
  0x4c   : > { %549 = vrcp.f32 %v311_v43  ;;  %v324_v56 = vand.u32 2147483648, %v311_v43  ;;  %v322_v58 = vand.u32 2147483647, %v311_v43  ;;  %vm318_vm5 = vweird.f32 %v311_v43 }
  0x4e   : > { %v325_v60 = vor.u32 1.1754944e-38, %v324_v56  ;;  %vm323_vm7 = vcmp.eq.f32.partialorder %v322_v58, 8.507059e+37 }
  0x52   : > { %v550_v52 = vpop.eup %549 }
  0x53   : > { %v314_v53 = vmul.f32 %v550_v52, %v311_v43  ;;  %vm319_vm4 = vweird.f32 %v550_v52 }
  0x54   : > { %vm320_vm6 = vmor %vm318_vm5, %vm319_vm4 }
  0x55   : > { %v315_v55 = vsub.f32 1.0, %v314_v53 }
  0x57   : > { %v316_v57 = vmul.f32 %v550_v52, %v315_v55 }
  0x59   : > { %v317_v59 = vadd.f32 %v550_v52, %v316_v57 }
  0x5b   : > { %v321_v61 = vsel %vm320_vm6, %v550_v52, %v317_v59 }
  0x5c   : > { %v326_v62 = vsel %vm323_vm7, %v325_v60, %v321_v61 }
  0x5d   : > { %v327_v63 = vmul.f32 %v548_v21, %v326_v62 }
  0x5f   : > { %v517_v0 = vadd.f32 -1.0, %v327_v63  ;;  %v348_v1 = vsub.f32 0.0, %v327_v63 }
  0x61   : > { %350 = vst [vmem:[#allocation1] ss:$2 sm:$0xff] %v517_v0 }
  0x68   : > { %v351_v4 = vld.sshfl [vmem:[#allocation1] sm:$0xff pattern:$0x75316420]  ;;  %v352_v5 = vld.sshfl [vmem:[#allocation1 + $0x8] sm:$0xff pattern:$0x75316420] }
  0x69   : > { %356 = vst [vmem:[#allocation1] ss:$2 sm:$0xff] %v348_v1 }
  0x70   : > { %v357_v8 = vld.sshfl [vmem:[#allocation1] sm:$0xff pattern:$0x75316420]  ;;  %v358_v9 = vld.sshfl [vmem:[#allocation1 + $0x8] sm:$0xff pattern:$0x75316420] }
  0x71   : > { %v361_v10 = vsel %vm638_vm1, %v351_v4, %v357_v8  ;;  %v362_v11 = vsel %vm642_vm2, %v352_v5, %v358_v9 }
  0x72   : > { %v370_v12 = vsel %vm368_vm9, %v362_v11, 0.0  ;;  %v369_v14 = vsel %vm367_vm10, %v361_v10, 0.0 }
  0x73   : > { %v373_v13 = vrot.slane %v370_v12, 4 }
  0x75   : > { %v374_v15 = vsel %vm265_vm0, %v369_v14, %v373_v13 }
  0x76   : > { %376 = vst [vmem:[%s246_s6] sm:$0xff] %v374_v15 }
  0x77 PF: > { %s14_s14 = sadd.s32 1, %s573_s14   ;;  %s680_s12 = smov %s569_s13 }
  0x78   : > { %p11_p6 = scmp.ge.s32.totalorder %s14_s14, 4   ;;  %s681_s13 = smov %s683_s15 }
  0x7a   :  { %13 = sbr.rel (!%p11_p6) target bundleno = 2 (0x2), region = 73 }

// kernel: lovasz_softmax_loss.3
= control target key start
LH: loop header
LB: loop body
LE: loop exit
PB: predicated region body
PF: predicated region fallthrough
CT: control target
= control target key end

     0   :  { %vm22_vm0 = vcmask 3072   ;;  %s1216_s0 = inlined_call_operand.vmem [shape: f32[4,512], index: 0, kind: input, shape index: {}]   ;;  %s1217_s1 = inlined_call_operand.vmem [shape: bf16[4,512], index: 1, kind: input, shape index: {}]   ;;  %s1218_s2 = inlined_call_operand.vmem [shape: f32[4,1], index: 2, kind: input, shape index: {}]   ;;  %s1219_s3 = inlined_call_operand.vmem [shape: bf16[256,256], index: 3, kind: input, shape index: {}]   ;;  %s1220_s4 = inlined_call_operand.hbm [shape: f32[1,1], index: 4, kind: output, shape index: {}]  }
   0x1   :  { %v655_v0 = vld [vmem:[%s1219_s3 + $0x70] sm:$0xf]  ;;  %v741_v1 = vld [vmem:[%s1219_s3 + $0x74] sm:$0xf0]  ;;  %v740_v5 = vld [vmem:[%s1219_s3 + $0x74] sm:$0xf] }
   0x2   :  { %v719_v2 = vld [vmem:[%s1219_s3 + $0xf0] sm:$0xf]  ;;  %v846_v3 = vor.u32 %v741_v1, %v655_v0  ;;  %v757_v4 = vld [vmem:[%s1219_s3 + $0xf4] sm:$0xf0]  ;;  %v657_v6 = vld [vmem:[%s1219_s3 + $0x78] sm:$0xf0] }
   0x3   :  { %v857_v7 = vor.u32 %v757_v4, %v719_v2  ;;  %v859_v8 = vor.u32 %v740_v5, %v657_v6  ;;  %v756_v9 = vld [vmem:[%s1219_s3 + $0xf4] sm:$0xf]  ;;  %v721_v10 = vld [vmem:[%s1219_s3 + $0xf8] sm:$0xf0]  ;;  %v647_v11 = vld [vmem:[%s1219_s3 + $0x60] sm:$0xf] }
   0x4   :  { %234 = vmatpush.bf16.msra.mxu0 %v846_v3  ;;  %v871_v12 = vor.u32 %v756_v9, %v721_v10  ;;  %v739_v13 = vld [vmem:[%s1219_s3 + $0x64] sm:$0xf0]  ;;  %v711_v14 = vld [vmem:[%s1219_s3 + $0xe0] sm:$0xf]  ;;  %v738_v18 = vld [vmem:[%s1219_s3 + $0x64] sm:$0xf] }
   0x5   :  { %v755_v15 = vld [vmem:[%s1219_s3 + $0xe4] sm:$0xf0]  ;;  %247 = vmatpush.bf16.msra.mxu1 %v857_v7  ;;  %260 = vmatpush.bf16.msra.mxu2 %v859_v8  ;;  %v884_v16 = vor.u32 %v739_v13, %v647_v11  ;;  %v649_v19 = vld [vmem:[%s1219_s3 + $0x68] sm:$0xf0]  ;;  %v754_v20 = vld [vmem:[%s1219_s3 + $0xe4] sm:$0xf] }
   0x6   :  { %v886_v17 = vor.u32 %v755_v15, %v711_v14  ;;  %273 = vmatpush.bf16.msra.mxu3 %v871_v12  ;;  %v898_v21 = vor.u32 %v738_v18, %v649_v19  ;;  %v713_v22 = vld [vmem:[%s1219_s3 + $0xe8] sm:$0xf0]  ;;  %v639_v23 = vld [vmem:[%s1219_s3 + $0x50] sm:$0xf]  ;;  %v737_v24 = vld [vmem:[%s1219_s3 + $0x54] sm:$0xf0] }
   0x7   :  { %v909_v25 = vor.u32 %v754_v20, %v713_v22  ;;  %v703_v26 = vld [vmem:[%s1219_s3 + $0xd0] sm:$0xf]  ;;  %v753_v27 = vld [vmem:[%s1219_s3 + $0xd4] sm:$0xf0]  ;;  %v736_v28 = vld [vmem:[%s1219_s3 + $0x54] sm:$0xf]  ;;  %v921_v29 = vor.u32 %v737_v24, %v639_v23 }
   0x8   :  { %235 = vmatpush.bf16.msra.mxu0 %v884_v16  ;;  %v641_v30 = vld [vmem:[%s1219_s3 + $0x58] sm:$0xf0]  ;;  %v752_v31 = vld [vmem:[%s1219_s3 + $0xd4] sm:$0xf]  ;;  %v934_v33 = vor.u32 %v753_v27, %v703_v26  ;;  %v631_v35 = vld [vmem:[%s1219_s3 + $0x40] sm:$0xf] }
   0x9   :  { %v705_v32 = vld [vmem:[%s1219_s3 + $0xd8] sm:$0xf0]  ;;  %248 = vmatpush.bf16.msra.mxu1 %v886_v17  ;;  %261 = vmatpush.bf16.msra.mxu2 %v898_v21  ;;  %v936_v34 = vor.u32 %v736_v28, %v641_v30  ;;  %v735_v36 = vld [vmem:[%s1219_s3 + $0x44] sm:$0xf0]  ;;  %v695_v37 = vld [vmem:[%s1219_s3 + $0xc0] sm:$0xf] }
   0xa   :  { %274 = vmatpush.bf16.msra.mxu3 %v909_v25  ;;  %v948_v38 = vor.u32 %v752_v31, %v705_v32  ;;  %v751_v39 = vld [vmem:[%s1219_s3 + $0xc4] sm:$0xf0]  ;;  %v734_v40 = vld [vmem:[%s1219_s3 + $0x44] sm:$0xf]  ;;  %v633_v41 = vld [vmem:[%s1219_s3 + $0x48] sm:$0xf0]  ;;  %v966_v44 = vor.u32 %v735_v36, %v631_v35 }
   0xb   :  { %v750_v42 = vld [vmem:[%s1219_s3 + $0xc4] sm:$0xf]  ;;  %v697_v43 = vld [vmem:[%s1219_s3 + $0xc8] sm:$0xf0]  ;;  %v970_v45 = vor.u32 %v751_v39, %v695_v37  ;;  %v972_v46 = vor.u32 %v734_v40, %v633_v41  ;;  %v623_v47 = vld [vmem:[%s1219_s3 + $0x30] sm:$0xf] }
   0xc   :  { %236 = vmatpush.bf16.msra.mxu0 %v921_v29  ;;  %v733_v48 = vld [vmem:[%s1219_s3 + $0x34] sm:$0xf0]  ;;  %v687_v49 = vld [vmem:[%s1219_s3 + $0xb0] sm:$0xf]  ;;  %v984_v50 = vor.u32 %v750_v42, %v697_v43  ;;  %v732_v52 = vld [vmem:[%s1219_s3 + $0x34] sm:$0xf] }
   0xd   :  { %249 = vmatpush.bf16.msra.mxu1 %v934_v33  ;;  %262 = vmatpush.bf16.msra.mxu2 %v936_v34  ;;  %v749_v51 = vld [vmem:[%s1219_s3 + $0xb4] sm:$0xf0]  ;;  %v625_v53 = vld [vmem:[%s1219_s3 + $0x38] sm:$0xf0]  ;;  %v748_v54 = vld [vmem:[%s1219_s3 + $0xb4] sm:$0xf]  ;;  %v1002_v56 = vor.u32 %v733_v48, %v623_v47 }
   0xe   :  { %275 = vmatpush.bf16.msra.mxu3 %v948_v38  ;;  %v689_v55 = vld [vmem:[%s1219_s3 + $0xb8] sm:$0xf0]  ;;  %v1006_v57 = vor.u32 %v749_v51, %v687_v49  ;;  %v1008_v58 = vor.u32 %v732_v52, %v625_v53  ;;  %v615_v59 = vld [vmem:[%s1219_s3 + $0x20] sm:$0xf]  ;;  %v731_v60 = vld [vmem:[%s1219_s3 + $0x24] sm:$0xf0] }
   0xf   :  { %v679_v61 = vld [vmem:[%s1219_s3 + $0xa0] sm:$0xf]  ;;  %v1020_v62 = vor.u32 %v748_v54, %v689_v55  ;;  %v747_v63 = vld [vmem:[%s1219_s3 + $0xa4] sm:$0xf0]  ;;  %v730_v0 = vld [vmem:[%s1219_s3 + $0x24] sm:$0xf]  ;;  %v1038_v5 = vor.u32 %v731_v60, %v615_v59 }
  0x10   :  { %237 = vmatpush.bf16.msra.mxu0 %v966_v44  ;;  %v617_v1 = vld [vmem:[%s1219_s3 + $0x28] sm:$0xf0]  ;;  %v746_v2 = vld [vmem:[%s1219_s3 + $0xa4] sm:$0xf]  ;;  %v607_v6 = vld [vmem:[%s1219_s3 + $0x10] sm:$0xf]  ;;  %v1051_v11 = vor.u32 %v747_v63, %v679_v61 }
  0x11   :  { %250 = vmatpush.bf16.msra.mxu1 %v970_v45  ;;  %263 = vmatpush.bf16.msra.mxu2 %v972_v46  ;;  %v681_v4 = vld [vmem:[%s1219_s3 + $0xa8] sm:$0xf0]  ;;  %v729_v9 = vld [vmem:[%s1219_s3 + $0x14] sm:$0xf0]  ;;  %v671_v10 = vld [vmem:[%s1219_s3 + $0x90] sm:$0xf]  ;;  %v1053_v13 = vor.u32 %v730_v0, %v617_v1 }
  0x12   :  { %276 = vmatpush.bf16.msra.mxu3 %v984_v50  ;;  %v745_v14 = vld [vmem:[%s1219_s3 + $0x94] sm:$0xf0]  ;;  %v728_v15 = vld [vmem:[%s1219_s3 + $0x14] sm:$0xf]  ;;  %v609_v18 = vld [vmem:[%s1219_s3 + $0x18] sm:$0xf0]  ;;  %v1065_v19 = vor.u32 %v746_v2, %v681_v4  ;;  %v1080_v26 = vor.u32 %v729_v9, %v607_v6 }
  0x13   :  { %v744_v20 = vld [vmem:[%s1219_s3 + $0x94] sm:$0xf]  ;;  %v673_v22 = vld [vmem:[%s1219_s3 + $0x98] sm:$0xf0]  ;;  %v66_v23 = vld [vmem:[%s1217_s1] sm:$0xf] }
  0x14   :  { %238 = vmatpush.bf16.msra.mxu0 %v1002_v56  ;;  %v599_v24 = vld [vmem:[%s1219_s3] sm:$0xf]  ;;  %69 = vst [vmem:[#allocation1] ss:$4 sm:$0xff] %v66_v23  ;;  %v807_v27 = vmov 0   ;;  %v808_v28 = vmov 0.0  }
  0x15   :  { %251 = vmatpush.bf16.msra.mxu1 %v1006_v57  ;;  %264 = vmatpush.bf16.msra.mxu2 %v1008_v58  ;;  %23 = vst.msk [vmem:[#allocation2] sm:$0xf] %vm22_vm0, %v808_v28  ;;  %v1087_v30 = vld [vmem:[%s1218_s2] sm:$0xf] }
  0x16   :  { %277 = vmatpush.bf16.msra.mxu3 %v1020_v62  ;;  %767 = vset.pattern.permute.xlu0 %v807_v27 }
  0x18   :  { %239 = vmatpush.bf16.msra.mxu0 %v1038_v5 }
  0x19   :  { %9 = vsyncpa [#allocation6], 0  ;;  %252 = vmatpush.bf16.msra.mxu1 %v1051_v11  ;;  %265 = vmatpush.bf16.msra.mxu2 %v1053_v13  ;;  %v1091_v31 = vor.u32 %v745_v14, %v671_v10  ;;  %v612_v32 = vor.u32 %v728_v15, %v609_v18  ;;  %v727_v35 = vld [vmem:[%s1219_s3 + $0x4] sm:$0xf0]  ;;  %v663_v36 = vld [vmem:[%s1219_s3 + $0x80] sm:$0xf]  ;;  %v676_v37 = vor.u32 %v744_v20, %v673_v22 }
  0x1a   :  { %24 = vst.msk [vmem:[#allocation3] sm:$0xf] %vm22_vm0, %v808_v28  ;;  %278 = vmatpush.bf16.msra.mxu3 %v1065_v19  ;;  %v743_v39 = vld [vmem:[%s1219_s3 + $0x84] sm:$0xf0]  ;;  %v726_v40 = vld [vmem:[%s1219_s3 + $0x4] sm:$0xf]  ;;  %769 = vset.pattern.permute.xlu1 %v807_v27  ;;  %v600_v47 = vor.u32 %v727_v35, %v599_v24 }
  0x1b   :  { %v601_v41 = vld [vmem:[%s1219_s3 + $0x8] sm:$0xf0]  ;;  %v742_v42 = vld [vmem:[%s1219_s3 + $0x84] sm:$0xf]  ;;  %303 = vperm.xlu1 %769, %v1087_v30   ;;  %770 = vset.pattern.permute.xlu2 %v807_v27  ;;  %v664_v49 = vor.u32 %v743_v39, %v663_v36  ;;  %s811_s22 = smov [#allocation5]   ;;  %s588_s26 = sshll.u32 %s1220_s4, 4  ;;  %s589_s26 = int_to_ptr.hbm [resolvable:$true] %s588_s26 }
  0x1c   :  { %v665_v43 = vld [vmem:[%s1219_s3 + $0x88] sm:$0xf0]  ;;  %240 = vmatpush.bf16.msra.mxu0 %v1080_v26  ;;  %v372_v48 = vld [vmem:[%s1217_s1 + $0x4] sm:$0xf]  ;;  %v604_v51 = vor.u32 %v726_v40, %v601_v41  ;;  %v64_v55 = vld [vmem:[#allocation2] sm:$0xf] }
  0x1d   :  { %253 = vmatpush.bf16.msra.mxu1 %v1091_v31  ;;  %266 = vmatpush.bf16.msra.mxu2 %v612_v32  ;;  %v668_v52 = vor.u32 %v742_v42, %v665_v43  ;;  %v70_v53 = vld.sshfl [vmem:[#allocation1] sm:$0xff pattern:$0x73625140]  ;;  %v71_v54 = vld.sshfl [vmem:[#allocation1 + $0x8] sm:$0xff pattern:$0x73625140] }
  0x1e   :  { %279 = vmatpush.bf16.msra.mxu3 %v676_v37  ;;  %375 = vst [vmem:[#allocation1] ss:$4 sm:$0xff] %v372_v48  ;;  %288 = vperm.xlu0 %767, %v64_v55   ;;  %s810_s1 = smov 1   ;;  %s586_s23 = sshll.u32 %s811_s22, 4  ;;  %s587_s23 = int_to_ptr.vmem [resolvable:$true] %s586_s23 }
  0x20   :  { %241 = vmatpush.bf16.msra.mxu0 %v600_v47 }
  0x21   :  { %254 = vmatpush.bf16.msra.mxu1 %v664_v49  ;;  %267 = vmatpush.bf16.msra.mxu2 %v604_v51 }
  0x22   :  { %280 = vmatpush.bf16.msra.mxu3 %v668_v52 }
  0x23   :  { %242 = vmatmul.bf16.vlgmr.msra.gmra.mxu0 %v70_v53 }
  0x24   :  { %255 = vmatmul.bf16.vlgmr.msra.gmra.mxu1 %v71_v54  ;;  %268 = vmatmul.bf16.vlgmr.msra.gmra.mxu2 %v70_v53 }
  0x25   :  { %406 = vmatpush.bf16.msrb.mxu2 %v859_v8  ;;  %281 = vmatmul.bf16.vlgmr.msra.gmra.mxu3 %v71_v54  ;;  %v809_v8 = vmov 127  }
  0x26   :  { %419 = vmatpush.bf16.msrb.mxu3 %v871_v12  ;;  %380 = vmatpush.bf16.msrb.mxu0 %v846_v3  ;;  %v376_v3 = vld.sshfl [vmem:[#allocation1] sm:$0xff pattern:$0x73625140]  ;;  %v60_v12 = vlaneseq }
  0x27   :  { %393 = vmatpush.bf16.msrb.mxu1 %v857_v7  ;;  %v377_v7 = vld.sshfl [vmem:[#allocation1 + $0x8] sm:$0xff pattern:$0x73625140]  ;;  %768 = vset.pattern.permute.xlu0 %v809_v8 }
  0x29   :  { %407 = vmatpush.bf16.msrb.mxu2 %v898_v21 }
  0x2a   :  { %420 = vmatpush.bf16.msrb.mxu3 %v909_v25  ;;  %381 = vmatpush.bf16.msrb.mxu0 %v884_v16  ;;  %v1149_v16 = vand.u32 127, %v60_v12 }
  0x2b   :  { %394 = vmatpush.bf16.msrb.mxu1 %v886_v17 }
  0x2c   :  { %v295_v17 = vadd.s32 1, %v1149_v16  ;;  %v441_v8 = vadd.s32 257, %v1149_v16 }
  0x2d   :  { %408 = vmatpush.bf16.msrb.mxu2 %v936_v34 }
  0x2e   :  { %421 = vmatpush.bf16.msrb.mxu3 %v948_v38  ;;  %382 = vmatpush.bf16.msrb.mxu0 %v921_v29  ;;  %v297_v38 = vcvt.s32.f32 %v295_v17  ;;  %v443_v17 = vcvt.s32.f32 %v441_v8 }
  0x2f   :  { %395 = vmatpush.bf16.msrb.mxu1 %v934_v33  ;;  %v1153_v33 = vadd.s32 128, %v1149_v16 }
  0x31   :  { %409 = vmatpush.bf16.msrb.mxu2 %v972_v46  ;;  %v442_v12 = vadd.s32 257, %v1153_v33 }
  0x32   :  { %422 = vmatpush.bf16.msrb.mxu3 %v984_v50  ;;  %383 = vmatpush.bf16.msrb.mxu0 %v966_v44 }
  0x33   :  { %396 = vmatpush.bf16.msrb.mxu1 %v970_v45  ;;  %v296_v45 = vadd.s32 1, %v1153_v33 }
  0x35   :  { %410 = vmatpush.bf16.msrb.mxu2 %v1008_v58  ;;  %v298_v61 = vcvt.s32.f32 %v296_v45 }
  0x36   :  { %423 = vmatpush.bf16.msrb.mxu3 %v1020_v62  ;;  %384 = vmatpush.bf16.msrb.mxu0 %v1002_v56 }
  0x37   :  { %397 = vmatpush.bf16.msrb.mxu1 %v1006_v57 }
  0x39   :  { %411 = vmatpush.bf16.msrb.mxu2 %v1053_v13 }
  0x3a   :  { %424 = vmatpush.bf16.msrb.mxu3 %v1065_v19  ;;  %385 = vmatpush.bf16.msrb.mxu0 %v1038_v5 }
  0x3b   :  { %398 = vmatpush.bf16.msrb.mxu1 %v1051_v11 }
  0x3d   :  { %412 = vmatpush.bf16.msrb.mxu2 %v612_v32 }
  0x3e   :  { %425 = vmatpush.bf16.msrb.mxu3 %v676_v37  ;;  %386 = vmatpush.bf16.msrb.mxu0 %v1080_v26 }
  0x3f   :  { %399 = vmatpush.bf16.msrb.mxu1 %v1091_v31 }
  0x41   :  { %413 = vmatpush.bf16.msrb.mxu2 %v604_v51 }
  0x42   :  { %426 = vmatpush.bf16.msrb.mxu3 %v668_v52  ;;  %387 = vmatpush.bf16.msrb.mxu0 %v600_v47 }
  0x43   :  { %400 = vmatpush.bf16.msrb.mxu1 %v664_v49 }
  0x44   :  { %414 = vmatmul.bf16.vlgmr.msrb.gmra.mxu2 %v376_v3 }
  0x45   :  { %427 = vmatmul.bf16.vlgmr.msrb.gmra.mxu3 %v377_v7  ;;  %388 = vmatmul.bf16.vlgmr.msrb.gmra.mxu0 %v376_v3 }
  0x46   :  { %401 = vmatmul.bf16.vlgmr.msrb.gmra.mxu1 %v377_v7 }
  0x8d   :  { %v1156_v46 = vpop.permute.xlu1 %303 }
  0x90   :  { %v289_v29 = vpop.permute.xlu0 %288 }
  0xa0   :  { %v243_v21 = vpop.f32.mrf.mxu0 }
  0xa1   :  { %v256_v25 = vpop.f32.mrf.mxu1 }
  0xa2   :  { %v257_v34 = vadd.f32 %v256_v25, %v243_v21  ;;  %v444_v21 = vcvt.s32.f32 %v442_v12 }
  0xa4   :  { %v291_v44 = vadd.f32 %v289_v29, %v257_v34 }
  0xa6   :  { %v299_v50 = vsub.f32 %v297_v38, %v291_v44  ;;  %v308_v20 = vsub.f32 %v1156_v46, %v291_v44 }
  0xa7   :  { %v269_v56 = vpop.f32.mrf.mxu2 }
  0xa8   :  { %v282_v57 = vpop.f32.mrf.mxu3  ;;  %v306_v58 = vadd.f32 %v1156_v46, %v299_v50  ;;  %v245_v59 = vpop.f32.mrf.mxu0 }
  0xa9   :  { %v283_v60 = vadd.f32 %v282_v57, %v269_v56  ;;  %v258_v62 = vpop.f32.mrf.mxu1 }
  0xaa   :  { %771 = vrcp.f32 %v306_v58  ;;  %v321_v10 = vand.u32 2147483648, %v306_v58  ;;  %vm315_vm1 = vweird.f32 %v306_v58  ;;  %v319_v13 = vand.u32 2147483647, %v306_v58 }
  0xab   :  { %v292_v63 = vadd.f32 %v289_v29, %v283_v60 }
  0xac   :  { %v322_v18 = vor.u32 1.1754944e-38, %v321_v10  ;;  %vm320_vm4 = vcmp.eq.f32.partialorder %v319_v13, 8.507059e+37 }
  0xad   :  { %v300_v0 = vsub.f32 %v298_v61, %v292_v63  ;;  %434 = vperm.xlu0 %768, %v292_v63   ;;  %v309_v39 = vsub.f32 %v1156_v46, %v292_v63 }
  0xaf   :  { %v307_v1 = vadd.f32 %v1156_v46, %v300_v0  ;;  %v271_v2 = vpop.f32.mrf.mxu2 }
  0xb0   :  { %v772_v4 = vpop.eup %771  ;;  %v284_v5 = vpop.f32.mrf.mxu3 }
  0xb1   :  { %773 = vrcp.f32 %v307_v1  ;;  %v311_v6 = vmul.f32 %v772_v4, %v306_v58  ;;  %vm316_vm2 = vweird.f32 %v772_v4  ;;  %v336_v27 = vand.u32 2147483648, %v307_v1 }
  0xb2   :  { %vm317_vm3 = vmor %vm315_vm1, %vm316_vm2  ;;  %v334_v32 = vand.u32 2147483647, %v307_v1  ;;  %vm330_vm6 = vweird.f32 %v307_v1  ;;  %vm346_vm2 = vcmp.lt.s32.totalorder %v1149_v16, 1 }
  0xb3   :  { %v312_v9 = vsub.f32 1.0, %v311_v6  ;;  %v337_v37 = vor.u32 1.1754944e-38, %v336_v27 }
  0xb4   :  { %vm335_vm8 = vcmp.eq.f32.partialorder %v334_v32, 8.507059e+37 }
  0xb5   :  { %v313_v11 = vmul.f32 %v772_v4, %v312_v9 }
  0xb7   :  { %v774_v14 = vpop.eup %773  ;;  %v314_v15 = vadd.f32 %v772_v4, %v313_v11 }
  0xb8   :  { %v326_v19 = vmul.f32 %v774_v14, %v307_v1  ;;  %vm331_vm5 = vweird.f32 %v774_v14 }
  0xb9   :  { %v318_v22 = vsel %vm317_vm3, %v772_v4, %v314_v15  ;;  %vm332_vm7 = vmor %vm330_vm6, %vm331_vm5  ;;  %vm349_vm3 = vcmp.eq.s32.totalorder %v1149_v16, 0  ;;  %v67_v16 = vld [vmem:[%s1216_s0] sm:$0xff]  ;;  %vm517_vm5 = vcmp.gt.f32.partialorder %v1087_v30, 0.0  ;;  %vm25_vm6 = vcmask 0  }
  0xba   :  { %v323_v23 = vsel %vm320_vm4, %v322_v18, %v318_v22  ;;  %v327_v24 = vsub.f32 1.0, %v326_v19  ;;  %vm367_vm4 = vcmask 1043456   ;;  %v725_v12 = vsel %vm517_vm5, 1.0, %v808_v28  ;;  %26 = vst.msk [vmem:[#allocation4] sm:$0x1] %vm25_vm6, %v808_v28 }
  0xbb   :  { %v1161_v26 = vmul.f32 %v323_v23, %v308_v20 }
  0xbc   :  { %v328_v31 = vmul.f32 %v774_v14, %v327_v24  ;;  %v65_v24 = vld [vmem:[#allocation3] sm:$0xf] }
  0xbd   :  { %v340_v35 = vsub.f32 1.0, %v1161_v26  ;;  %v373_v26 = vld [vmem:[%s1216_s0 + $0x8] sm:$0xff] }
  0xbe   :  { %v329_v36 = vadd.f32 %v774_v14, %v328_v31 }
  0xbf   :  { %342 = vrot.lane.b32.xlu1 %v340_v35, %s810_s1 }
  0xc0   :  { %v333_v40 = vsel %vm332_vm7, %v774_v14, %v329_v36 }
  0xc1   :  { %v338_v41 = vsel %vm335_vm8, %v337_v37, %v333_v40  ;;  %v520_v28 = vld [vmem:[#allocation4] sm:$0x1] }
  0xc2   :  { %v389_v42 = vpop.f32.mrf.mxu0  ;;  %v339_v43 = vmul.f32 %v338_v41, %v309_v39 }
  0xc3   :  { %v402_v47 = vpop.f32.mrf.mxu1 }
  0xc4   :  { %v403_v48 = vadd.f32 %v402_v47, %v389_v42  ;;  %v1168_v49 = vsub.f32 1.0, %v339_v43 }
  0xc6   :  { %491 = vperm.xlu0 %768, %v1168_v49   ;;  %344 = vrot.lane.b32.xlu2 %v1168_v49, %s810_s1 }
  0xc7   :  { %v415_v51 = vpop.f32.mrf.mxu2 }
  0xc8   :  { %v428_v52 = vpop.f32.mrf.mxu3 }
  0xc9   :  { %v429_v53 = vadd.f32 %v428_v52, %v415_v51 }
  0xca   :  { %v391_v54 = vpop.f32.mrf.mxu0 }
  0xcb   :  { %v404_v55 = vpop.f32.mrf.mxu1 }
  0xcf   :  { %v417_v3 = vpop.f32.mrf.mxu2 }
  0xd0   :  { %v430_v7 = vpop.f32.mrf.mxu3 }
 0x11f   :  { %v435_v25 = vpop.permute.xlu0 %434 }
 0x120   :  { %v437_v29 = vadd.f32 %v435_v25, %v403_v48  ;;  %v1175_v34 = vadd.f32 %v435_v25, %v429_v53  ;;  %v345_v27 = vpop.permute.xlu2 %344 }
 0x122   :  { %v445_v38 = vsub.f32 %v443_v17, %v437_v29  ;;  %v446_v44 = vsub.f32 %v444_v21, %v1175_v34  ;;  %v449_v9 = vsub.f32 %v1156_v46, %v437_v29  ;;  %v450_v13 = vsub.f32 %v1156_v46, %v1175_v34 }
 0x123   :  { %v550_v17 = vsel %vm22_vm0, %v725_v12, 0.0 }
 0x124   :  { %v447_v45 = vadd.f32 %v445_v38, %v1156_v46  ;;  %v448_v50 = vadd.f32 %v446_v44, %v1156_v46  ;;  %551 = vadd.xlane.f32.xlu0 %v550_v17 }
 0x126   :  { %775 = vrcp.f32 %v447_v45  ;;  %v462_v60 = vand.u32 2147483648, %v447_v45  ;;  %v460_v63 = vand.u32 2147483647, %v447_v45  ;;  %v477_v0 = vand.u32 2147483648, %v448_v50 }
 0x127   :  { %777 = vrcp.f32 %v448_v50  ;;  %v475_v2 = vand.u32 2147483647, %v448_v50  ;;  %vm456_vm11 = vweird.f32 %v447_v45  ;;  %vm471_vm13 = vweird.f32 %v448_v50 }
 0x128   :  { %v463_v5 = vor.u32 1.1754944e-38, %v462_v60  ;;  %vm461_vm14 = vcmp.eq.f32.partialorder %v460_v63, 8.507059e+37  ;;  %v478_v11 = vor.u32 1.1754944e-38, %v477_v0 }
 0x129   :  { %vm476_vm1 = vcmp.eq.f32.partialorder %v475_v2, 8.507059e+37 }
 0x12c   :  { %v776_v56 = vpop.eup %775 }
 0x12d   :  { %v778_v57 = vpop.eup %777  ;;  %v452_v58 = vmul.f32 %v776_v56, %v447_v45  ;;  %vm457_vm9 = vweird.f32 %v776_v56 }
 0x12e   :  { %v467_v59 = vmul.f32 %v778_v57, %v448_v50  ;;  %vm472_vm10 = vweird.f32 %v778_v57  ;;  %vm458_vm12 = vmor %vm456_vm11, %vm457_vm9 }
 0x12f   :  { %v453_v33 = vsub.f32 1.0, %v452_v58  ;;  %vm473_vm15 = vmor %vm471_vm13, %vm472_vm10 }
 0x130   :  { %v468_v61 = vsub.f32 1.0, %v467_v59 }
 0x131   :  { %v454_v62 = vmul.f32 %v776_v56, %v453_v33  ;;  %v343_v32 = vpop.permute.xlu1 %342 }
 0x132   :  { %v469_v1 = vmul.f32 %v778_v57, %v468_v61  ;;  %v347_v36 = vsel %vm346_vm2, %v343_v32, %v345_v27  ;;  %v348_v37 = vsel %vm346_vm2, %v345_v27, %v343_v32 }
 0x133   :  { %v455_v4 = vadd.f32 %v776_v56, %v454_v62  ;;  %v363_v40 = vsub.f32 %v1168_v49, %v347_v36 }
 0x134   :  { %v470_v6 = vadd.f32 %v778_v57, %v469_v1 }
 0x135   :  { %v459_v10 = vsel %vm458_vm12, %v776_v56, %v455_v4  ;;  %v366_v51 = vrot.slane %v363_v40, 4 }
 0x136   :  { %v464_v14 = vsel %vm461_vm14, %v463_v5, %v459_v10  ;;  %v474_v15 = vsel %vm473_vm15, %v778_v57, %v470_v6 }
 0x137   :  { %v465_v18 = vmul.f32 %v464_v14, %v449_v9  ;;  %v479_v19 = vsel %vm476_vm1, %v478_v11, %v474_v15 }
 0x138   :  { %v480_v20 = vmul.f32 %v479_v19, %v450_v13  ;;  %v492_v43 = vpop.permute.xlu0 %491 }
 0x139   :  { %v481_v22 = vsub.f32 1.0, %v465_v18 }
 0x13a   :  { %v482_v23 = vsub.f32 1.0, %v480_v20 }
 0x13b   :  { %483 = vrot.lane.b32.xlu2 %v481_v22, %s810_s1 }
 0x13c   :  { %485 = vrot.lane.b32.xlu1 %v482_v23, %s810_s1 }
 0x143   :  { %357 = vperm.xlu2 %770, %v65_v24  }
 0x195   :  { %v484_v31 = vpop.permute.xlu2 %483 }
 0x197   :  { %v552_v58 = vpop.xlane.xlu0 %551 }
 0x198   :  { %v553_v59 = vrot.slane %v552_v58, 4 }
 0x19a   :  { %v554_v33 = vadd.f32 %v553_v59, %v552_v58 }
 0x19c   :  { %v555_v60 = vrot.slane %v554_v33, 2 }
 0x19d   :  { %v358_v46 = vpop.permute.xlu2 %357 }
 0x19e   :  { %v360_v39 = vsel %vm349_vm3, %v358_v46, %v348_v37  ;;  %v556_v0 = vadd.f32 %v555_v60, %v554_v33 }
 0x19f   :  { %v362_v41 = vsub.f32 %v340_v35, %v360_v39 }
 0x1a0   :  { %v557_v5 = vrot.slane %v556_v0, 1 }
 0x1a1   :  { %v368_v3 = vsel %vm367_vm4, %v362_v41, %v366_v51 }
 0x1a2   :  { %v370_v49 = vmul.f32 %v368_v3, %v67_v16  ;;  %v558_v9 = vadd.f32 %v557_v5, %v556_v0 }
 0x1ae   :  { %v486_v42 = vpop.permute.xlu1 %485 }
 0x1af   :  { %v487_v47 = vsel %vm346_vm2, %v484_v31, %v486_v42  ;;  %v488_v48 = vsel %vm346_vm2, %v486_v42, %v484_v31 }
 0x1b0   :  { %v494_v52 = vsel %vm349_vm3, %v492_v43, %v488_v48  ;;  %v497_v53 = vsub.f32 %v482_v23, %v487_v47 }
 0x1b1   :  { %v496_v54 = vsub.f32 %v481_v22, %v494_v52 }
 0x1b2   :  { %v500_v55 = vrot.slane %v497_v53, 4 }
 0x1b4   :  { %v501_v35 = vsel %vm367_vm4, %v496_v54, %v500_v55 }
 0x1b5   :  { %v503_v7 = vmul.f32 %v501_v35, %v373_v26 }
 0x1b7   :  { %v504_v8 = vadd.f32 %v503_v7, %v370_v49 }
 0x1b9   :  { %506 = vst [vmem:[#allocation1] ss:$2 sm:$0xff] %v504_v8 }
 0x1c0   :  { %v507_v21 = vld.sshfl [vmem:[#allocation1] sm:$0xff pattern:$0x75316420]  ;;  %v508_v25 = vld.sshfl [vmem:[#allocation1 + $0x8] sm:$0xff pattern:$0x75316420] }
 0x1c1   :  { %v511_v29 = vsel %vm367_vm4, %v507_v21, 0.0  ;;  %v512_v38 = vsel %vm367_vm4, %v508_v25, 0.0 }
 0x1c2   :  { %v513_v44 = vadd.f32 %v512_v38, %v511_v29 }
 0x1c4   :  { %514 = vadd.xlane.f32.xlu1 %v513_v44 }
 0x1dd   :  { %543 = vrot.lane.b32.xlu1 %v482_v23, %s810_s1 }
 0x237   :  { %v515_v45 = vpop.xlane.xlu1 %514 }
 0x238   :  { %v516_v50 = vsub.f32 0.0, %v515_v45 }
 0x23a   :  { %v521_v56 = vmul.f32 %v725_v12, %v516_v50 }
 0x23c   :  { %v523_v30 = vsel %vm22_vm0, %v521_v56, 0.0 }
 0x23d   :  { %524 = vadd.xlane.f32.xlu2 %v523_v30 }
 0x24f   :  { %v544_v57 = vpop.permute.xlu1 %543 }
 0x250   :  { %546 = vst.msk [vmem:[#allocation3] sm:$0xf] %vm22_vm0, %v544_v57 }
 0x255   :  { %538 = vrot.lane.b32.xlu2 %v1175_v34, %s810_s1 }
 0x2b0   :  { %v525_v61 = vpop.xlane.xlu2 %524 }
 0x2b1   :  { %v526_v62 = vrot.slane %v525_v61, 4 }
 0x2b3   :  { %v527_v63 = vadd.f32 %v526_v62, %v525_v61 }
 0x2b5   :  { %v528_v1 = vrot.slane %v527_v63, 2 }
 0x2b7   :  { %v529_v2 = vadd.f32 %v528_v1, %v527_v63 }
 0x2b8   :  { %v539_v4 = vpop.permute.xlu2 %538 }
 0x2b9   :  { %541 = vst.msk [vmem:[#allocation2] sm:$0xf] %vm22_vm0, %v539_v4  ;;  %v530_v6 = vrot.slane %v529_v2, 1 }
 0x2bb   :  { %v531_v34 = vadd.f32 %v530_v6, %v529_v2 }
 0x2bd   :  { %758 = vpush %v531_v34 }
 0x2be   :  { %760 = vpush %v558_v9 }
 0x2ee   :  { %s759_s0 = spop %758 }
 0x2ef   :  { %v533_v10 = vstv %s759_s0  ;;  %s761_s21 = spop %760 }
 0x2f0   :  { %v534_v11 = vadd.f32 %v533_v10, %v520_v28  ;;  %v560_v13 = vstv %s761_s21 }
 0x2f1   :  { %v563_v14 = vmax.f32 %v560_v13, 1.0  ;;  %vm562_vm10 = vcmp.gt.f32.partialorder %v560_v13, 0.0 }
 0x2f2   :  { %536 = vst.msk [vmem:[#allocation4] sm:$0x1] %vm25_vm6, %v534_v11 }
 0x2f3   :  { %779 = vrcp.f32 %v563_v14  ;;  %v575_v20 = vand.u32 2147483648, %v563_v14  ;;  %v573_v23 = vand.u32 2147483647, %v563_v14  ;;  %vm569_vm7 = vweird.f32 %v563_v14 }
 0x2f5   :  { %v576_v27 = vor.u32 1.1754944e-38, %v575_v20  ;;  %vm574_vm9 = vcmp.eq.f32.partialorder %v573_v23, 8.507059e+37 }
 0x2f9   :  { %v780_v15 = vpop.eup %779  ;;  %v561_v32 = vld [vmem:[#allocation4] sm:$0x1] }
 0x2fa   :  { %v565_v18 = vmul.f32 %v780_v15, %v563_v14  ;;  %vm570_vm0 = vweird.f32 %v780_v15 }
 0x2fb   :  { %vm571_vm8 = vmor %vm569_vm7, %vm570_vm0 }
 0x2fc   :  { %v566_v19 = vsub.f32 1.0, %v565_v18 }
 0x2fe   :  { %v567_v22 = vmul.f32 %v780_v15, %v566_v19 }
 0x300   :  { %v568_v24 = vadd.f32 %v780_v15, %v567_v22 }
 0x302   :  { %v572_v31 = vsel %vm571_vm8, %v780_v15, %v568_v24 }
 0x303   :  { %v577_v46 = vsel %vm574_vm9, %v576_v27, %v572_v31 }
 0x304   :  { %v578_v36 = vmul.f32 %v577_v46, %v561_v32 }
 0x306   :  { %v579_v37 = vsel %vm562_vm10, %v578_v36, 0.0 }
 0x307   :  { %580 = vst.msk [vmem:[#allocation5] sm:$0x1] %vm25_vm6, %v579_v37 }
 0x308   :  { %591 = dma.vmem_to_hbm [thread:$0]  %s587_s23, 16, %s589_s26, [#allocation6]  }
 0x309   :  { %805 = dma.done.wait [#allocation6], 16  }
 0x30a   :  { %806 = vsyncadd [#allocation6], 4294967280 }
 0x30b   :  { %596 = vsyncpa [#allocation6], 1 }

</bundles_post_ra>
